<compile_context>
chip_gen: v5e
topology: v5e:2x2
jax: 0.10.0
libtpu: 0.0.40
codegen_flags: <defaults>
</compile_context>

<pallas_src>
import jax
import jax.numpy as jnp
from jax.experimental import pallas as pl
from jax.experimental.pallas import tpu as pltpu


def _make_double_conv_kernel(BH, H, compute_dtype):
    """Kernel closed over the static row count (BH = images_per_step * H)."""

    def kernel(x_ref, m1_ref, b1_ref, m2_ref, b2_ref, o_ref):
        # x_ref:  (BH, W*Cin)          lane-packed (w, cin) rows
        # m1_ref: (3, W*Cin, W*Cmid)   banded conv1 weights (BN1 scale folded),
        #                              taps ordered dy = -1, 0, +1
        # b1_ref: (1, W*Cmid)          BN1 bias tiled over w
        # m2_ref: (3, W*Cmid, W*Cout)  banded conv2 weights (BN2 scale folded)
        # b2_ref: (1, W*Cout)          BN2 bias tiled over w
        # o_ref:  (BH, W*Cout)         lane-dense output
        x = x_ref[...]                                          # (BH, W*Cin) f32

        def conv(v, m_ref, b_ref):
            # Per-image row index (rolls must not leak across image boundaries).
            h = jax.lax.broadcasted_iota(jnp.int32, v.shape, 0) % H
            not_first = h != 0            # row h-1 exists inside this image
            not_last = h != (H - 1)       # row h+1 exists inside this image

            # dy = 0 tap initializes the accumulator (identity matmul removed).
            acc = jnp.dot(v.astype(compute_dtype), m_ref[1],
                          preferred_element_type=jnp.float32)
            # dy = -1: output row h reads input row h-1 (roll down, zero top row).
            v_dn = jnp.where(not_first, pltpu.roll(v, shift=1, axis=0), 0.0)
            acc = acc + jnp.dot(v_dn.astype(compute_dtype), m_ref[0],
                                preferred_element_type=jnp.float32)
            # dy = +1: output row h reads input row h+1 (roll up, zero bottom row).
            v_up = jnp.where(not_last, pltpu.roll(v, shift=BH - 1, axis=0), 0.0)
            acc = acc + jnp.dot(v_up.astype(compute_dtype), m_ref[2],
                                preferred_element_type=jnp.float32)
            # Folded-BN bias + ReLU (scale already folded into m_ref).
            return jnp.maximum(acc + b_ref[...], 0.0)

        y1 = conv(x, m1_ref, b1_ref)                            # (BH, W*Cmid) f32
        y2 = conv(y1, m2_ref, b2_ref)                           # (BH, W*Cout) f32
        o_ref[...] = y2.astype(o_ref.dtype)

    return kernel


def _fold_bn(bn, eps):
    gamma, beta, mean, var = bn
    scale = gamma / jnp.sqrt(var + eps)
    bias = beta - mean * scale
    return scale.astype(jnp.float32), bias.astype(jnp.float32)


def _band_matrices(w_hwio, scale, W):
    """Three banded (W*Cin, W*Cout) matrices, one per row tap dy.

    M_dy[w'*Cin + ci, w*Cout + co] = scale[co] * w_hwio[dy+1, (w'-w)+1, ci, co]
    for |w' - w| <= 1, else 0.  Width-boundary zero padding is implicit.
    """
    _, _, Cin, Cout = w_hwio.shape
    wf = w_hwio.astype(jnp.float32) * scale[None, None, None, :]  # fold BN scale
    wp = jnp.arange(W)[:, None]
    w = jnp.arange(W)[None, :]
    dx = wp - w                                                   # (W, W)
    valid = jnp.abs(dx) <= 1
    tap = jnp.clip(dx + 1, 0, 2)                                  # (W, W) in {0,1,2}
    mats = []
    for ky in range(3):                                           # dy = ky - 1
        blocks = wf[ky][tap]                                      # (W, W, Cin, Cout)
        blocks = jnp.where(valid[:, :, None, None], blocks, 0.0)
        mats.append(jnp.transpose(blocks, (0, 2, 1, 3)).reshape(W * Cin, W * Cout))
    return jnp.stack(mats, axis=0)                                # (3, W*Cin, W*Cout)


def double_conv_pallas(x_nchw, w1, bn1, w2, bn2, eps=1e-5, *,
                       images_per_step=None, matmul_dtype=jnp.bfloat16):
    """x_nchw: (N, Cin, H, W) float32.  w*: HWIO.  bn*: (gamma, beta, mean, var)."""
    N, Cin, H, W = x_nchw.shape
    Cmid = w1.shape[-1]
    Cout = w2.shape[-1]
    assert H % 8 == 0, "row-blocked layout needs H to be a multiple of 8 sublanes"

    s1, b1 = _fold_bn(bn1, eps)
    s2, b2 = _fold_bn(bn2, eps)

    # Images per grid step: fill the MXU M dimension (>= 128 rows) while keeping
    # at least 2 grid steps when N >= 2 so both v7x TensorCores get work.
    if images_per_step is None:
        B = max(1, min(pl.cdiv(128, H), N // 2 if N >= 2 else 1))
    else:
        B = max(1, images_per_step)
    n_steps = pl.cdiv(N, B)
    Npad = n_steps * B
    BH = B * H

    # Layout plumbing (wrapper side): NCHW -> NHWC -> (N*H, W*Cin) so the lane
    # axis carries packed (w, c) and each grid step sees one lane-dense
    # (B*H, W*C) slab.  Pad N up to a multiple of B with zero images.
    x_rows = jnp.transpose(x_nchw, (0, 2, 3, 1)).astype(jnp.float32)
    x_rows = x_rows.reshape(N * H, W * Cin)
    if Npad != N:
        x_rows = jnp.pad(x_rows, ((0, (Npad - N) * H), (0, 0)))

    # Banded weights carry the BN scale and the W-boundary padding; cast to the
    # MXU operand dtype at the boundary (halves their DMA bytes for bf16).
    M1 = _band_matrices(w1, s1, W).astype(matmul_dtype)          # (3, W*Cin,  W*Cmid)
    M2 = _band_matrices(w2, s2, W).astype(matmul_dtype)          # (3, W*Cmid, W*Cout)
    b1_row = jnp.tile(b1, W)[None, :]                            # (1, W*Cmid) f32
    b2_row = jnp.tile(b2, W)[None, :]                            # (1, W*Cout) f32

    kernel = _make_double_conv_kernel(BH, H, matmul_dtype)

    out_rows = pl.pallas_call(
        kernel,
        out_shape=jax.ShapeDtypeStruct((Npad * H, W * Cout), jnp.float32),
        grid_spec=pltpu.PrefetchScalarGridSpec(
            num_scalar_prefetch=0,
            grid=(n_steps,),
            in_specs=[
                pl.BlockSpec((BH, W * Cin), lambda n: (n, 0)),
                pl.BlockSpec((3, W * Cin, W * Cmid), lambda n: (0, 0, 0)),
                pl.BlockSpec((1, W * Cmid), lambda n: (0, 0)),
                pl.BlockSpec((3, W * Cmid, W * Cout), lambda n: (0, 0, 0)),
                pl.BlockSpec((1, W * Cout), lambda n: (0, 0)),
            ],
            out_specs=pl.BlockSpec((BH, W * Cout), lambda n: (n, 0)),
        ),
        compiler_params=pltpu.CompilerParams(
            dimension_semantics=("parallel",)),
    )(x_rows, M1, b1_row, M2, b2_row)

    # (Npad*H, W*Cout) -> trim padding -> NHWC -> NCHW (PyTorch convention).
    out_nhwc = out_rows[: N * H].reshape(N, H, W, Cout)
    return jnp.transpose(out_nhwc, (0, 3, 1, 2))


def double_conv_reference(x_nchw, w1, bn1, w2, bn2, eps=1e-5):
    """Pure-JAX reference (eval-mode semantics) for validation."""
    def conv(x, w):  # x NCHW, w HWIO
        return jax.lax.conv_general_dilated(
            x, w, window_strides=(1, 1), padding="SAME",
            dimension_numbers=("NCHW", "HWIO", "NCHW"))

    def bn_relu(x, bn):
        gamma, beta, mean, var = bn
        scale = (gamma / jnp.sqrt(var + eps))[None, :, None, None]
        bias = (beta - mean * gamma / jnp.sqrt(var + eps))[None, :, None, None]
        return jnp.maximum(x * scale + bias, 0.0)

    y = bn_relu(conv(x_nchw, w1), bn1)
    return bn_relu(conv(y, w2), bn2)


if __name__ == "__main__":
    # Small shapes consistent with the module: N=2, Cin=4, H=W=16, mid=out=8.
    N, Cin, H, W = 2, 4, 16, 16
    Cmid = Cout = 8

    key = jax.random.PRNGKey(0)
    kx, kw1, kw2, kg1, kb1, km1, kv1, kg2, kb2, km2, kv2 = jax.random.split(key, 11)

    x = jax.random.normal(kx, (N, Cin, H, W), jnp.float32)

    # Conv weights in HWIO, small deterministic init.
    w1 = jax.random.normal(kw1, (3, 3, Cin, Cmid), jnp.float32) * 0.1
    w2 = jax.random.normal(kw2, (3, 3, Cmid, Cout), jnp.float32) * 0.1

    # BatchNorm params (gamma, beta, running_mean, running_var), eval-mode.
    bn1 = (1.0 + 0.1 * jax.random.normal(kg1, (Cmid,), jnp.float32),
           0.1 * jax.random.normal(kb1, (Cmid,), jnp.float32),
           0.1 * jax.random.normal(km1, (Cmid,), jnp.float32),
           1.0 + 0.1 * jax.random.uniform(kv1, (Cmid,), jnp.float32))
    bn2 = (1.0 + 0.1 * jax.random.normal(kg2, (Cout,), jnp.float32),
           0.1 * jax.random.normal(kb2, (Cout,), jnp.float32),
           0.1 * jax.random.normal(km2, (Cout,), jnp.float32),
           1.0 + 0.1 * jax.random.uniform(kv2, (Cout,), jnp.float32))

    ref = double_conv_reference(x, w1, bn1, w2, bn2)

    # 1) f32 MXU operands: exact eval-mode semantics, tight tolerance.
    out_f32 = jax.block_until_ready(
        double_conv_pallas(x, w1, bn1, w2, bn2, matmul_dtype=jnp.float32))
    assert out_f32.shape == (N, Cout, H, W)
    assert jnp.allclose(out_f32, ref, rtol=1e-4, atol=1e-4), "f32 mismatch vs reference"

    # 2) bf16 MXU operands / f32 accumulation (perf config per review).  The
    #    bf16 quantization of activations & folded weights needs a looser bound.
    out_bf16 = jax.block_until_ready(double_conv_pallas(x, w1, bn1, w2, bn2))
    assert out_bf16.shape == (N, Cout, H, W)
    assert jnp.allclose(out_bf16, ref, rtol=5e-2, atol=5e-2), "bf16 mismatch vs reference"

    # 3) Batched-grid path: enough images that each grid step carries a full
    #    128-row MXU slab (B*H = 128) while still splitting across 2 grid steps.
    N_big = 16
    x_big = jax.random.normal(jax.random.PRNGKey(1), (N_big, Cin, H, W), jnp.float32)
    ref_big = double_conv_reference(x_big, w1, bn1, w2, bn2)
    out_big = jax.block_until_ready(double_conv_pallas(x_big, w1, bn1, w2, bn2))
    assert out_big.shape == (N_big, Cout, H, W)
    assert jnp.allclose(out_big, ref_big, rtol=5e-2, atol=5e-2), "batched mismatch vs reference"

    print("KERNEL_OK")
</pallas_src>

<mosaic_0001>
module attributes {stable_mosaic.version = 11 : i64} {
  func.func @kernel(%arg0: i32, %arg1: memref<16x64xf32, #tpu.memory_space<vmem>>, %arg2: memref<3x64x128xf32, #tpu.memory_space<vmem>>, %arg3: memref<1x128xf32, #tpu.memory_space<vmem>>, %arg4: memref<3x128x128xf32, #tpu.memory_space<vmem>>, %arg5: memref<1x128xf32, #tpu.memory_space<vmem>>, %arg6: memref<16x128xf32, #tpu.memory_space<vmem>>) attributes {dimension_semantics = [#tpu.dimension_semantics<parallel>], iteration_bounds = array<i64: 2>, scalar_prefetch = 0 : i64, scratch_operands = 0 : i64, tpu.core_type = #tpu.core_type<tc>, window_params = [{transform_indices = @transform_0, window_bounds = array<i64: 16, 64>}, {pipeline_mode = #tpu.pipeline_mode<synchronous>, transform_indices = @transform_1, window_bounds = array<i64: 3, 64, 128>}, {pipeline_mode = #tpu.pipeline_mode<synchronous>, transform_indices = @transform_2, window_bounds = array<i64: 1, 128>}, {pipeline_mode = #tpu.pipeline_mode<synchronous>, transform_indices = @transform_3, window_bounds = array<i64: 3, 128, 128>}, {pipeline_mode = #tpu.pipeline_mode<synchronous>, transform_indices = @transform_4, window_bounds = array<i64: 1, 128>}, {transform_indices = @transform_5, window_bounds = array<i64: 16, 128>}]} {
    %c0 = arith.constant 0 : index
    %c0_0 = arith.constant 0 : index
    %0 = vector.load %arg1[%c0, %c0_0] : memref<16x64xf32, #tpu.memory_space<vmem>>, vector<16x64xf32>
    %1 = tpu.iota {dimensions = array<i32: 0>} : vector<16x64xi32>
    %c16_i32 = arith.constant 16 : i32
    %c0_i32 = arith.constant 0 : i32
    %2 = arith.cmpi eq, %c16_i32, %c0_i32 : i32
    %c1_i32 = arith.constant 1 : i32
    %3 = arith.select %2, %c1_i32, %c16_i32 : i32
    %4 = vector.broadcast %3 : i32 to vector<16x64xi32>
    %5 = arith.remsi %1, %4 : vector<16x64xi32>
    %c0_i32_1 = arith.constant 0 : i32
    %6 = vector.broadcast %c0_i32_1 : i32 to vector<16x64xi32>
    %7 = arith.cmpi ne, %5, %6 : vector<16x64xi32>
    %c0_i32_2 = arith.constant 0 : i32
    %8 = vector.broadcast %c0_i32_2 : i32 to vector<16x64xi32>
    %9 = arith.cmpi slt, %5, %8 : vector<16x64xi32>
    %c0_i32_3 = arith.constant 0 : i32
    %10 = arith.cmpi slt, %3, %c0_i32_3 : i32
    %11 = vector.broadcast %10 : i1 to vector<16x64xi1>
    %12 = vector.broadcast %11 : vector<16x64xi1> to vector<16x64xi1>
    %13 = arith.xori %9, %12 : vector<16x64xi1>
    %14 = arith.andi %13, %7 : vector<16x64xi1>
    %15 = vector.broadcast %3 : i32 to vector<16x64xi32>
    %16 = arith.addi %5, %15 : vector<16x64xi32>
    %17 = arith.select %14, %16, %5 : vector<16x64xi1>, vector<16x64xi32>
    %c0_i32_4 = arith.constant 0 : i32
    %18 = vector.broadcast %c0_i32_4 : i32 to vector<16x64xi32>
    %19 = arith.cmpi ne, %17, %18 : vector<16x64xi32>
    %c15_i32 = arith.constant 15 : i32
    %20 = vector.broadcast %c15_i32 : i32 to vector<16x64xi32>
    %21 = arith.cmpi ne, %17, %20 : vector<16x64xi32>
    %c1 = arith.constant 1 : index
    %c0_5 = arith.constant 0 : index
    %c0_6 = arith.constant 0 : index
    %22 = vector.load %arg2[%c1, %c0_5, %c0_6] : memref<3x64x128xf32, #tpu.memory_space<vmem>>, vector<1x64x128xf32>
    %23 = vector.shape_cast %22 : vector<1x64x128xf32> to vector<64x128xf32>
    %cst = arith.constant dense<0.000000e+00> : vector<16x128xf32>
    %24 = tpu.matmul %0, %23, %cst {dimension_numbers = #tpu.dot_dimension_numbers<[1], [0], [0], [1], [0, 0, 1, 1], [], []>} : vector<16x64xf32>, vector<64x128xf32>, vector<16x128xf32> -> vector<16x128xf32>
    %c1_i32_7 = arith.constant 1 : i32
    %25 = tpu.dynamic_rotate %0 by %c1_i32_7 dim 0 : vector<16x64xf32>, i32 -> vector<16x64xf32>
    %cst_8 = arith.constant 0.000000e+00 : f32
    %26 = vector.broadcast %cst_8 : f32 to vector<16x64xf32>
    %27 = arith.select %19, %25, %26 : vector<16x64xi1>, vector<16x64xf32>
    %c0_9 = arith.constant 0 : index
    %c0_10 = arith.constant 0 : index
    %c0_11 = arith.constant 0 : index
    %28 = vector.load %arg2[%c0_9, %c0_10, %c0_11] : memref<3x64x128xf32, #tpu.memory_space<vmem>>, vector<1x64x128xf32>
    %29 = vector.shape_cast %28 : vector<1x64x128xf32> to vector<64x128xf32>
    %cst_12 = arith.constant dense<0.000000e+00> : vector<16x128xf32>
    %30 = tpu.matmul %27, %29, %cst_12 {dimension_numbers = #tpu.dot_dimension_numbers<[1], [0], [0], [1], [0, 0, 1, 1], [], []>} : vector<16x64xf32>, vector<64x128xf32>, vector<16x128xf32> -> vector<16x128xf32>
    %31 = arith.addf %24, %30 : vector<16x128xf32>
    %c15_i32_13 = arith.constant 15 : i32
    %32 = tpu.dynamic_rotate %0 by %c15_i32_13 dim 0 : vector<16x64xf32>, i32 -> vector<16x64xf32>
    %cst_14 = arith.constant 0.000000e+00 : f32
    %33 = vector.broadcast %cst_14 : f32 to vector<16x64xf32>
    %34 = arith.select %21, %32, %33 : vector<16x64xi1>, vector<16x64xf32>
    %c2 = arith.constant 2 : index
    %c0_15 = arith.constant 0 : index
    %c0_16 = arith.constant 0 : index
    %35 = vector.load %arg2[%c2, %c0_15, %c0_16] : memref<3x64x128xf32, #tpu.memory_space<vmem>>, vector<1x64x128xf32>
    %36 = vector.shape_cast %35 : vector<1x64x128xf32> to vector<64x128xf32>
    %cst_17 = arith.constant dense<0.000000e+00> : vector<16x128xf32>
    %37 = tpu.matmul %34, %36, %cst_17 {dimension_numbers = #tpu.dot_dimension_numbers<[1], [0], [0], [1], [0, 0, 1, 1], [], []>} : vector<16x64xf32>, vector<64x128xf32>, vector<16x128xf32> -> vector<16x128xf32>
    %38 = arith.addf %31, %37 : vector<16x128xf32>
    %c0_18 = arith.constant 0 : index
    %c0_19 = arith.constant 0 : index
    %39 = vector.load %arg3[%c0_18, %c0_19] : memref<1x128xf32, #tpu.memory_space<vmem>>, vector<1x128xf32>
    %40 = vector.broadcast %39 : vector<1x128xf32> to vector<16x128xf32>
    %41 = arith.addf %38, %40 : vector<16x128xf32>
    %cst_20 = arith.constant 0.000000e+00 : f32
    %42 = vector.broadcast %cst_20 : f32 to vector<16x128xf32>
    %43 = arith.maximumf %41, %42 : vector<16x128xf32>
    %44 = tpu.iota {dimensions = array<i32: 0>} : vector<16x128xi32>
    %c16_i32_21 = arith.constant 16 : i32
    %c0_i32_22 = arith.constant 0 : i32
    %45 = arith.cmpi eq, %c16_i32_21, %c0_i32_22 : i32
    %c1_i32_23 = arith.constant 1 : i32
    %46 = arith.select %45, %c1_i32_23, %c16_i32_21 : i32
    %47 = vector.broadcast %46 : i32 to vector<16x128xi32>
    %48 = arith.remsi %44, %47 : vector<16x128xi32>
    %c0_i32_24 = arith.constant 0 : i32
    %49 = vector.broadcast %c0_i32_24 : i32 to vector<16x128xi32>
    %50 = arith.cmpi ne, %48, %49 : vector<16x128xi32>
    %c0_i32_25 = arith.constant 0 : i32
    %51 = vector.broadcast %c0_i32_25 : i32 to vector<16x128xi32>
    %52 = arith.cmpi slt, %48, %51 : vector<16x128xi32>
    %c0_i32_26 = arith.constant 0 : i32
    %53 = arith.cmpi slt, %46, %c0_i32_26 : i32
    %54 = vector.broadcast %53 : i1 to vector<16x128xi1>
    %55 = vector.broadcast %54 : vector<16x128xi1> to vector<16x128xi1>
    %56 = arith.xori %52, %55 : vector<16x128xi1>
    %57 = arith.andi %56, %50 : vector<16x128xi1>
    %58 = vector.broadcast %46 : i32 to vector<16x128xi32>
    %59 = arith.addi %48, %58 : vector<16x128xi32>
    %60 = arith.select %57, %59, %48 : vector<16x128xi1>, vector<16x128xi32>
    %c0_i32_27 = arith.constant 0 : i32
    %61 = vector.broadcast %c0_i32_27 : i32 to vector<16x128xi32>
    %62 = arith.cmpi ne, %60, %61 : vector<16x128xi32>
    %c15_i32_28 = arith.constant 15 : i32
    %63 = vector.broadcast %c15_i32_28 : i32 to vector<16x128xi32>
    %64 = arith.cmpi ne, %60, %63 : vector<16x128xi32>
    %c1_29 = arith.constant 1 : index
    %c0_30 = arith.constant 0 : index
    %c0_31 = arith.constant 0 : index
    %65 = vector.load %arg4[%c1_29, %c0_30, %c0_31] : memref<3x128x128xf32, #tpu.memory_space<vmem>>, vector<1x128x128xf32>
    %66 = vector.shape_cast %65 : vector<1x128x128xf32> to vector<128x128xf32>
    %cst_32 = arith.constant dense<0.000000e+00> : vector<16x128xf32>
    %67 = tpu.matmul %43, %66, %cst_32 {dimension_numbers = #tpu.dot_dimension_numbers<[1], [0], [0], [1], [0, 0, 1, 1], [], []>} : vector<16x128xf32>, vector<128x128xf32>, vector<16x128xf32> -> vector<16x128xf32>
    %c1_i32_33 = arith.constant 1 : i32
    %68 = tpu.dynamic_rotate %43 by %c1_i32_33 dim 0 : vector<16x128xf32>, i32 -> vector<16x128xf32>
    %cst_34 = arith.constant 0.000000e+00 : f32
    %69 = vector.broadcast %cst_34 : f32 to vector<16x128xf32>
    %70 = arith.select %62, %68, %69 : vector<16x128xi1>, vector<16x128xf32>
    %c0_35 = arith.constant 0 : index
    %c0_36 = arith.constant 0 : index
    %c0_37 = arith.constant 0 : index
    %71 = vector.load %arg4[%c0_35, %c0_36, %c0_37] : memref<3x128x128xf32, #tpu.memory_space<vmem>>, vector<1x128x128xf32>
    %72 = vector.shape_cast %71 : vector<1x128x128xf32> to vector<128x128xf32>
    %cst_38 = arith.constant dense<0.000000e+00> : vector<16x128xf32>
    %73 = tpu.matmul %70, %72, %cst_38 {dimension_numbers = #tpu.dot_dimension_numbers<[1], [0], [0], [1], [0, 0, 1, 1], [], []>} : vector<16x128xf32>, vector<128x128xf32>, vector<16x128xf32> -> vector<16x128xf32>
    %74 = arith.addf %67, %73 : vector<16x128xf32>
    %c15_i32_39 = arith.constant 15 : i32
    %75 = tpu.dynamic_rotate %43 by %c15_i32_39 dim 0 : vector<16x128xf32>, i32 -> vector<16x128xf32>
    %cst_40 = arith.constant 0.000000e+00 : f32
    %76 = vector.broadcast %cst_40 : f32 to vector<16x128xf32>
    %77 = arith.select %64, %75, %76 : vector<16x128xi1>, vector<16x128xf32>
    %c2_41 = arith.constant 2 : index
    %c0_42 = arith.constant 0 : index
    %c0_43 = arith.constant 0 : index
    %78 = vector.load %arg4[%c2_41, %c0_42, %c0_43] : memref<3x128x128xf32, #tpu.memory_space<vmem>>, vector<1x128x128xf32>
    %79 = vector.shape_cast %78 : vector<1x128x128xf32> to vector<128x128xf32>
    %cst_44 = arith.constant dense<0.000000e+00> : vector<16x128xf32>
    %80 = tpu.matmul %77, %79, %cst_44 {dimension_numbers = #tpu.dot_dimension_numbers<[1], [0], [0], [1], [0, 0, 1, 1], [], []>} : vector<16x128xf32>, vector<128x128xf32>, vector<16x128xf32> -> vector<16x128xf32>
    %81 = arith.addf %74, %80 : vector<16x128xf32>
    %c0_45 = arith.constant 0 : index
    %c0_46 = arith.constant 0 : index
    %82 = vector.load %arg5[%c0_45, %c0_46] : memref<1x128xf32, #tpu.memory_space<vmem>>, vector<1x128xf32>
    %83 = vector.broadcast %82 : vector<1x128xf32> to vector<16x128xf32>
    %84 = arith.addf %81, %83 : vector<16x128xf32>
    %cst_47 = arith.constant 0.000000e+00 : f32
    %85 = vector.broadcast %cst_47 : f32 to vector<16x128xf32>
    %86 = arith.maximumf %84, %85 : vector<16x128xf32>
    %c0_48 = arith.constant 0 : index
    %c0_49 = arith.constant 0 : index
    %87 = vector.load %arg6[%c0_48, %c0_49] : memref<16x128xf32, #tpu.memory_space<vmem>>, vector<16x128xf32>
    tpu.vector_store %arg6[%c0_48, %c0_49], %86 {strides = array<i32>} : memref<16x128xf32, #tpu.memory_space<vmem>>, vector<16x128xf32>,
    return
  }
  func.func @transform_0(%arg0: i32) -> (i32, i32) {
    %c0_i32 = arith.constant 0 : i32
    %c0_i32_0 = arith.constant 0 : i32
    return %arg0, %c0_i32 : i32, i32
  }
  func.func @transform_1(%arg0: i32) -> (i32, i32, i32) {
    %c0_i32 = arith.constant 0 : i32
    %c0_i32_0 = arith.constant 0 : i32
    %c0_i32_1 = arith.constant 0 : i32
    %c0_i32_2 = arith.constant 0 : i32
    return %c0_i32, %c0_i32_0, %c0_i32_1 : i32, i32, i32
  }
  func.func @transform_2(%arg0: i32) -> (i32, i32) {
    %c0_i32 = arith.constant 0 : i32
    %c0_i32_0 = arith.constant 0 : i32
    %c0_i32_1 = arith.constant 0 : i32
    return %c0_i32, %c0_i32_0 : i32, i32
  }
  func.func @transform_3(%arg0: i32) -> (i32, i32, i32) {
    %c0_i32 = arith.constant 0 : i32
    %c0_i32_0 = arith.constant 0 : i32
    %c0_i32_1 = arith.constant 0 : i32
    %c0_i32_2 = arith.constant 0 : i32
    return %c0_i32, %c0_i32_0, %c0_i32_1 : i32, i32, i32
  }
  func.func @transform_4(%arg0: i32) -> (i32, i32) {
    %c0_i32 = arith.constant 0 : i32
    %c0_i32_0 = arith.constant 0 : i32
    %c0_i32_1 = arith.constant 0 : i32
    return %c0_i32, %c0_i32_0 : i32, i32
  }
  func.func @transform_5(%arg0: i32) -> (i32, i32) {
    %c0_i32 = arith.constant 0 : i32
    %c0_i32_0 = arith.constant 0 : i32
    return %arg0, %c0_i32 : i32, i32
  }
}

</mosaic_0001>

<bundles_post_ra>
// kernel: tpu_custom_call.1
= control target key start
LH: loop header
LB: loop body
LE: loop exit
PB: predicated region body
PF: predicated region fallthrough
CT: control target
= control target key end

     0   :  { %10 = vsyncpa [#allocation3], 0  ;;  %s1215_s0 = inlined_call_operand.hbm [shape: f32[32,64], index: 0, kind: input, shape index: {}]   ;;  %s1216_s1 = inlined_call_operand.hbm [shape: f32[3,64,128], index: 1, kind: input, shape index: {}]   ;;  %s1217_s2 = inlined_call_operand.vmem [shape: f32[1,128], index: 2, kind: input, shape index: {}]   ;;  %s1218_s3 = inlined_call_operand.hbm [shape: f32[3,128,128], index: 3, kind: input, shape index: {}]   ;;  %s1219_s4 = inlined_call_operand.vmem [shape: f32[1,128], index: 4, kind: input, shape index: {}]   ;;  %s1220_s5 = inlined_call_operand.hbm [shape: f32[32,128], index: 5, kind: output, shape index: {}]  }
   0x1   :  { %12 = vsyncpa [#allocation3 + $0x1], 0 }
   0x2   :  { %13 = vsyncpa [#allocation6], 0 }
   0x3   :  { %14 = vsyncpa [#allocation4], 0 }
   0x4   :  { %16 = vsyncpa [#allocation4 + $0x1], 0  ;;  %s1001_s18 = smov 0   ;;  %s1003_s19 = smov 0  }
   0x5   :  { %s1005_s20 = smov 0   ;;  %s1007_s21 = smov 0  }
   0x6 LB: > { %s1022_s22 = sadd.s32 4294967295, %s963_s21   ;;  %s702_s23 = sadd.s32 4294967294, %s963_s21   ;;  %s963_s21 = sphi %s1007_s21, %s1236_s21   ;;  %s959_s20 = sphi %s1005_s20, %s1235_s20   ;;  %s955_s19 = sphi %s1003_s19, %s1234_s19   ;;  %s951_s18 = sphi %s1001_s18, %s1233_s18  }
   0x7   : > { %p42_p0 = scmp.ne.s32.totalorder %s955_s19, %s951_s18  ;;  %p43_p1 = scmp.eq.s32.totalorder %s1022_s22, 0 }
   0x8   : > { %p150_p2 = scmp.eq.s32.totalorder %s1022_s22, 1  ;;  %p156_p3 = scmp.eq.s32.totalorder %s702_s23, 1 }
   0x9   : > { %p1031_p4 = por %p43_p1, %p42_p0  ;;  %p703_p5 = scmp.ge.s32.totalorder %s963_s21, 1 }
   0xa   : > { %p1036_p6 = por %p156_p3, %p42_p0  ;;  %p163_p7 = scmp.lt.s32.totalorder %s963_s21, 3 }
   0xb   : > { %s174_s28 = sshll.u32 %s1216_s1, 4  ;;  %s965_s30 = smov [#allocation5]   ;;  %s175_s28 = int_to_ptr.hbm [resolvable:$true] %s174_s28 }
   0xc   : > { %p1044_p8 = pnand %p703_p5, %p163_p7  ;;  %s176_s6 = sshll.u32 %s965_s30, 4  ;;  %s177_s6 = int_to_ptr.vmem [resolvable:$true] %s176_s6 }
   0xd   : > { %s191_s9 = sshll.u32 %s1218_s3, 4  ;;  %s1221_s10 = smov 128   ;;  %s192_s9 = int_to_ptr.hbm [resolvable:$true] %s191_s9 }
   0xe   : > { %p742_p9 = pneg %p1044_p8  ;;  %s967_s11 = smov 8  }
   0xf   : > { %s968_s12 = smov [#allocation7]   ;;  %s1063_s14 = sadd.s32 1, %s963_s21  }
  0x10   : > { %p743_p10 = pnand %p742_p9, %p43_p1  ;;  %s193_s13 = sshll.u32 %s968_s12, 4  ;;  %s194_s13 = int_to_ptr.vmem [resolvable:$true] %s193_s13 }
  0x11   : > { %s29_s15 = sadd.s32 1, %s959_s20  ;;  %s26_s16 = ssub.s32 %s963_s21, %s1063_s14 }
  0x12   : > { %745 = dma.hbm_to_vmem [thread:$0]  (!%p743_p10), %s175_s28, 3072, %s177_s6, [#allocation6], %s1221_s10, %s1221_s10, %s967_s11  }
  0x13   : > { %748 = dma.hbm_to_vmem [thread:$0]  (!%p743_p10), %s192_s9, 6144, %s194_s13, [#allocation6], %s1221_s10, %s1221_s10, %s967_s11  }
  0x14   : > { %p36_p12 = scmp.ne.s32.totalorder %s959_s20, %s955_s19  ;;  %p27_p13 = scmp.eq.s32.totalorder %s26_s16, 0 }
  0x15   : > { %p37_p0 = scmp.eq.s32.totalorder %s963_s21, 0  ;;  %p759_p5 = scmp.lt.s32.totalorder %s963_s21, 2 }
  0x16   : > { %p1073_p3 = por %p150_p2, %p36_p12  ;;  %s210_s26 = sand.u32 1, %s959_s20  }
  0x17   : > { %s1079_s23 = scalar_select %p27_p13, %s959_s20, %s29_s15  }
  0x18   : > { %p38_p7 = por %p37_p0, %p36_p12  ;;  %s707_s27 = sshll.u32 %s210_s26, 4 }
  0x19   : > { %s728_s28 = sshll.u32 %s963_s21, 4  ;;  %s214_s8 = scalar_lea.vmem [#allocation2], %s707_s27 }
  0x1a   : > { %s219_s7 = scalar_lea.hbm %s1215_s0, %s728_s28  ;;  %s222_s9 = sshll.u32 %s214_s8, 4  ;;  %s223_s9 = int_to_ptr.vmem [resolvable:$true] %s222_s9 }
  0x1b   : > { %s220_s12 = sshll.u32 %s219_s7, 4  ;;  %p1086_p2 = pnand %p759_p5, %p38_p7  ;;  %s221_s12 = int_to_ptr.hbm [resolvable:$true] %s220_s12 }
  0x1c   : > { %s211_s15 = scalar_lea.sflag [#allocation3], %s210_s26  ;;  %s863_s16 = sshra.s32 %s221_s12, 4  ;;  %s864_s16 = int_to_ptr.hbm [resolvable:$true] %s863_s16 }
  0x1d   : > { %s865_s10 = scalar_lea.hbm %s864_s16, 16  ;;  %p867_p10 = pneg %p1086_p2 }
  0x1e   : > { %p866_p9 = scmp.ne.s32.totalorder %s864_s16, %s865_s10  ;;  %s870_s30 = scalar_lea.hbm %s1215_s0, 32 }
  0x1f   : > { %p871_p0 = scmp.lt.s32.totalorder %s864_s16, %s1215_s0  ;;  %p872_p5 = scmp.lt.s32.totalorder %s870_s30, %s865_s10 }
  0x20   : > { %p868_p12 = pnand %p867_p10, %p866_p9 }
  0x21   : > { %p873_p7 = por %p872_p5, %p871_p0 }
  0x22   : > { %p869_p13 = pneg %p868_p12 }
  0x24   : > { %p874_p11 = pnand %p873_p7, %p869_p13 }
  0x26   : > { %877 = shalt.err (!%p874_p11)
}
  0x27   : > { %s1227_s26 = smov 128   ;;  %234 = sbr.rel (%p1044_p8) target bundleno = 380 (0x17c), region = 40 }
  0x28   : > { %752 = dma.hbm_to_vmem [thread:$0]  (!%p1086_p2), %s221_s12, 256, %s223_s9, %s211_s15, %s1227_s26, %s1227_s26, %s967_s11  }
  0x29   : > { %s1106_s8 = sand.u32 (!%p1044_p8), 1, %s955_s19  }
  0x2a   : > { %s711_s10 = sshll.u32 (!%p1044_p8), %s1106_s8, 4  ;;  %s237_s16 = scalar_lea.sflag (!%p1044_p8), [#allocation3], %s1106_s8 }
  0x2b   : > { %s240_s28 = scalar_lea.vmem (!%p1044_p8), [#allocation2], %s711_s10 }
  0x2c   : > { %938 = dma.done.wait (%p1031_p4), %s237_s16, 256  }
  0x2d   : > { %940 = vsyncadd (%p1031_p4), %s237_s16, 4294967040 }
  0x2e   : > { %942 = dma.done.wait (%p43_p1), [#allocation6], 9216  }
  0x2f   : > { %944 = vsyncadd (%p43_p1), [#allocation6], 4294958080  ;;  %v282_v0 = vlaneseq  ;;  %v336_v1 = vld [vmem:[#allocation5 + $0x38] sm:$0xff]  ;;  %v335_v2 = vld [vmem:[#allocation5 + $0x30] sm:$0xff]  ;;  %vm337_vm2 = vcmask 523264   ;;  %s729_s12 = sshll.u32 %s1022_s22, 4 }
  0x30   : > { %352 = vmatpush.msra.mxu2 %v336_v1  ;;  %v321_v3 = vld [vmem:[#allocation5 + $0x78] sm:$0xff]  ;;  %v334_v4 = vld [vmem:[#allocation5 + $0x28] sm:$0xff]  ;;  %v320_v5 = vld [vmem:[#allocation5 + $0x70] sm:$0xff]  ;;  %s606_s27 = scalar_lea.hbm %s1220_s5, %s729_s12  ;;  %s277_s30 = scalar_lea.vmem [#allocation8], %s711_s10 }
  0x31   : > { %381 = vmatpush.msra.mxu1 %v321_v3  ;;  %v1120_v6 = vshrl.u32 %v282_v0, 7  ;;  %v319_v7 = vld [vmem:[#allocation5 + $0x68] sm:$0xff]  ;;  %v333_v8 = vld [vmem:[#allocation5 + $0x20] sm:$0xff]  ;;  %v332_v12 = vld [vmem:[#allocation5 + $0x18] sm:$0xff]  ;;  %s607_s6 = sshll.u32 %s277_s30, 4  ;;  %s609_s7 = sshll.u32 %s606_s27, 4  ;;  %s608_s6 = int_to_ptr.vmem [resolvable:$true] %s607_s6  ;;  %s610_s7 = int_to_ptr.hbm [resolvable:$true] %s609_s7 }
  0x32   : > { %353 = vmatpush.msra.mxu2 %v335_v2  ;;  %v1122_v9 = vld [vmem:[%s240_s28] sm:$0xff]  ;;  %v1124_v10 = vld [vmem:[%s240_s28 + $0x8] sm:$0xff]  ;;  %s595_s22 = scalar_lea.sflag [#allocation4], %s1106_s8  ;;  %s907_s26 = sshra.s32 %s610_s7, 4  ;;  %s908_s26 = int_to_ptr.hbm [resolvable:$true] %s907_s26 }
  0x33   : > { %382 = vmatpush.msra.mxu1 %v320_v5  ;;  %v318_v11 = vld [vmem:[#allocation5 + $0x60] sm:$0xff]  ;;  %v289_v13 = vand.u32 15, %v1120_v6  ;;  %v322_v14 = vrot.slane %v1122_v9, 7  ;;  %v323_v15 = vrot.slane %v1124_v10, 7  ;;  %v317_v16 = vld [vmem:[#allocation5 + $0x58] sm:$0xff]  ;;  %vm324_vm0 = vcmp.lt.s32.totalorder %v1120_v6, 1  ;;  %p914_p11 = scmp.lt.s32.totalorder %s908_s26, %s1220_s5 }
  0x34   : > { %354 = vmatpush.msra.mxu2 %v334_v4  ;;  %v331_v17 = vld [vmem:[#allocation5 + $0x10] sm:$0xff]  ;;  %v467_v18 = vld [vmem:[#allocation7 + $0xf8] sm:$0xff]  ;;  %v330_v19 = vld [vmem:[#allocation5 + $0x8] sm:$0xff]  ;;  %v396_v37 = vrot.slane %v1122_v9, 1  ;;  %v397_v38 = vrot.slane %v1124_v10, 1  ;;  %vm398_vm3 = vcmp.lt.s32.totalorder %v1120_v6, 7 }
  0x35   : > { %383 = vmatpush.msra.mxu1 %v319_v7  ;;  %v316_v20 = vld [vmem:[#allocation5 + $0x50] sm:$0xff]  ;;  %513 = vmatpush.msra.mxu0 %v467_v18  ;;  %vm1130_vm1 = vcmp.ne.s32.totalorder %v289_v13, 0  ;;  %v326_v23 = vsel %vm324_vm0, %v323_v15, %v322_v14  ;;  %v465_v24 = vld [vmem:[#allocation7 + $0xe8] sm:$0xff]  ;;  %v329_v26 = vld [vmem:[#allocation5] sm:$0xff]  ;;  %v325_v34 = vsel %vm324_vm0, %v322_v14, %v323_v15  ;;  %v284_v40 = vadd.s32 8, %v1120_v6  ;;  %s909_s16 = scalar_lea.hbm %s908_s26, 16 }
  0x36   : > { %355 = vmatpush.msra.mxu2 %v333_v8  ;;  %v466_v21 = vld [vmem:[#allocation7 + $0xf0] sm:$0xff]  ;;  %v315_v25 = vld [vmem:[#allocation5 + $0x48] sm:$0xff]  ;;  %v464_v27 = vld [vmem:[#allocation7 + $0xe0] sm:$0xff]  ;;  %v327_v28 = vsel %vm1130_vm1, %v326_v23, 0.0  ;;  %v399_v42 = vsel %vm398_vm3, %v396_v37, %v397_v38  ;;  %v400_v45 = vsel %vm398_vm3, %v397_v38, %v396_v37  ;;  %p910_p1 = scmp.ne.s32.totalorder %s908_s26, %s909_s16  ;;  %s913_s24 = scalar_lea.hbm %s1220_s5, 32 }
  0x37   : > { %384 = vmatpush.msra.mxu1 %v318_v11  ;;  %514 = vmatpush.msra.mxu0 %v466_v21  ;;  %v314_v29 = vld [vmem:[#allocation5 + $0x40] sm:$0xff]  ;;  %v411_v30 = vld [vmem:[#allocation5 + $0xb8] sm:$0xff]  ;;  %v410_v31 = vld [vmem:[#allocation5 + $0xb0] sm:$0xff]  ;;  %v296_v43 = vand.u32 15, %v284_v40  ;;  %p915_p2 = scmp.lt.s32.totalorder %s913_s24, %s909_s16 }
  0x38   : > { %356 = vmatpush.msra.mxu2 %v332_v12  ;;  %v409_v32 = vld [vmem:[#allocation5 + $0xa8] sm:$0xff]  ;;  %v408_v33 = vld [vmem:[#allocation5 + $0xa0] sm:$0xff]  ;;  %v407_v35 = vld [vmem:[#allocation5 + $0x98] sm:$0xff]  ;;  %p911_p4 = pnand %p910_p1, %p1073_p3 }
  0x39   : > { %385 = vmatpush.msra.mxu1 %v317_v16  ;;  %515 = vmatpush.msra.mxu0 %v465_v24  ;;  %v406_v36 = vld [vmem:[#allocation5 + $0x90] sm:$0xff]  ;;  %v405_v39 = vld [vmem:[#allocation5 + $0x88] sm:$0xff]  ;;  %v404_v41 = vld [vmem:[#allocation5 + $0x80] sm:$0xff]  ;;  %vm1153_vm4 = vcmp.ne.s32.totalorder %v296_v43, 15  ;;  %p916_p9 = por %p915_p2, %p914_p11 }
  0x3a   : > { %357 = vmatpush.msra.mxu2 %v331_v17  ;;  %v402_v46 = vsel %vm1153_vm4, %v400_v45, 0.0  ;;  %v463_v47 = vld [vmem:[#allocation7 + $0xd8] sm:$0xff]  ;;  %v462_v48 = vld [vmem:[#allocation7 + $0xd0] sm:$0xff]  ;;  %v461_v51 = vld [vmem:[#allocation7 + $0xc8] sm:$0xff]  ;;  %p912_p8 = pneg %p911_p4 }
  0x3b   : > { %386 = vmatpush.msra.mxu1 %v316_v20  ;;  %516 = vmatpush.msra.mxu0 %v464_v27  ;;  %v489_v49 = vld [vmem:[#allocation7 + $0x78] sm:$0xff]  ;;  %v488_v52 = vld [vmem:[#allocation7 + $0x70] sm:$0xff]  ;;  %v460_v54 = vld [vmem:[#allocation7 + $0xc0] sm:$0xff] }
  0x3c   : > { %358 = vmatpush.msra.mxu2 %v330_v19  ;;  %v558_v50 = vld [vmem:[#allocation7 + $0x178] sm:$0xff]  ;;  %490 = vmatpush.msra.mxu3 %v489_v49  ;;  %v557_v53 = vld [vmem:[#allocation7 + $0x170] sm:$0xff]  ;;  %v487_v55 = vld [vmem:[#allocation7 + $0x68] sm:$0xff]  ;;  %p917_p10 = pnand %p916_p9, %p912_p8 }
  0x3d   : > { %387 = vmatpush.msra.mxu1 %v315_v25  ;;  %517 = vmatpush.msra.mxu0 %v463_v47  ;;  %v556_v56 = vld [vmem:[#allocation7 + $0x168] sm:$0xff]  ;;  %v459_v57 = vld [vmem:[#allocation7 + $0xb8] sm:$0xff]  ;;  %v486_v58 = vld [vmem:[#allocation7 + $0x60] sm:$0xff] }
  0x3e   : > { %359 = vmatpush.msra.mxu2 %v329_v26  ;;  %491 = vmatpush.msra.mxu3 %v488_v52  ;;  %v555_v59 = vld [vmem:[#allocation7 + $0x160] sm:$0xff]  ;;  %v458_v60 = vld [vmem:[#allocation7 + $0xb0] sm:$0xff]  ;;  %v485_v61 = vld [vmem:[#allocation7 + $0x58] sm:$0xff] }
  0x3f   : > { %715 = vmatmul.msk.f32.vlgmr.msra.gmra.mxu2 %vm337_vm2, %v327_v28  ;;  %388 = vmatpush.msra.mxu1 %v314_v29  ;;  %v554_v62 = vld [vmem:[#allocation7 + $0x158] sm:$0xff]  ;;  %v457_v63 = vld [vmem:[#allocation7 + $0xa8] sm:$0xff]  ;;  %v484_v0 = vld [vmem:[#allocation7 + $0x50] sm:$0xff] }
  0x40   : > { %426 = vmatpush.msrb.mxu2 %v411_v30  ;;  %717 = vmatmul.msk.f32.vlgmr.msra.gmra.mxu1 %vm337_vm2, %v1122_v9  ;;  %v553_v1 = vld [vmem:[#allocation7 + $0x150] sm:$0xff]  ;;  %v456_v2 = vld [vmem:[#allocation7 + $0xa0] sm:$0xff]  ;;  %v483_v3 = vld [vmem:[#allocation7 + $0x48] sm:$0xff] }
  0x41   : > { %518 = vmatpush.msra.mxu0 %v462_v48  ;;  %559 = vmatpush.msrb.mxu1 %v558_v50  ;;  %v552_v4 = vld [vmem:[#allocation7 + $0x148] sm:$0xff]  ;;  %v455_v5 = vld [vmem:[#allocation7 + $0x98] sm:$0xff]  ;;  %v482_v7 = vld [vmem:[#allocation7 + $0x40] sm:$0xff] }
  0x42   : > { %427 = vmatpush.msrb.mxu2 %v410_v31  ;;  %492 = vmatpush.msra.mxu3 %v487_v55  ;;  %v551_v8 = vld [vmem:[#allocation7 + $0x140] sm:$0xff]  ;;  %v454_v9 = vld [vmem:[#allocation7 + $0x90] sm:$0xff]  ;;  %v550_v11 = vld [vmem:[#allocation7 + $0x138] sm:$0xff] }
  0x43   : > { %519 = vmatpush.msra.mxu0 %v461_v51  ;;  %560 = vmatpush.msrb.mxu1 %v557_v53  ;;  %v453_v12 = vld [vmem:[#allocation7 + $0x88] sm:$0xff]  ;;  %v480_v13 = vld [vmem:[#allocation7 + $0x30] sm:$0xff]  ;;  %v452_v15 = vld [vmem:[#allocation7 + $0x80] sm:$0xff] }
  0x44   : > { %428 = vmatpush.msrb.mxu2 %v409_v32  ;;  %493 = vmatpush.msra.mxu3 %v486_v58  ;;  %v549_v14 = vld [vmem:[#allocation7 + $0x130] sm:$0xff]  ;;  %v479_v16 = vld [vmem:[#allocation7 + $0x28] sm:$0xff]  ;;  %v478_v18 = vld [vmem:[#allocation7 + $0x20] sm:$0xff] }
  0x45   : > { %520 = vmatpush.msra.mxu0 %v460_v54  ;;  %561 = vmatpush.msrb.mxu1 %v556_v56  ;;  %v548_v17 = vld [vmem:[#allocation7 + $0x128] sm:$0xff]  ;;  %v547_v19 = vld [vmem:[#allocation7 + $0x120] sm:$0xff]  ;;  %v477_v20 = vld [vmem:[#allocation7 + $0x18] sm:$0xff] }
  0x46   : > { %429 = vmatpush.msrb.mxu2 %v408_v33  ;;  %494 = vmatpush.msra.mxu3 %v485_v61  ;;  %v546_v21 = vld [vmem:[#allocation7 + $0x118] sm:$0xff]  ;;  %v476_v23 = vld [vmem:[#allocation7 + $0x10] sm:$0xff]  ;;  %v475_v25 = vld [vmem:[#allocation7 + $0x8] sm:$0xff] }
  0x47   : > { %716 = vmatmul.msk.f32.gmra.mxu2 %vm337_vm2, %v325_v34  ;;  %521 = vmatpush.msra.mxu0 %v459_v57  ;;  %v545_v24 = vld [vmem:[#allocation7 + $0x110] sm:$0xff]  ;;  %v544_v26 = vld [vmem:[#allocation7 + $0x108] sm:$0xff]  ;;  %v474_v27 = vld [vmem:[#allocation7] sm:$0xff] }
  0x48   : > { %430 = vmatpush.msrb.mxu2 %v407_v35  ;;  %718 = vmatmul.msk.f32.gmra.mxu1 %vm337_vm2, %v1124_v10  ;;  %v481_v10 = vld [vmem:[#allocation7 + $0x38] sm:$0xff]  ;;  %v543_v28 = vld [vmem:[#allocation7 + $0x100] sm:$0xff] }
  0x49   : > { %562 = vmatpush.msrb.mxu1 %v555_v59  ;;  %522 = vmatpush.msra.mxu0 %v458_v60  ;;  %v801_v33 = vld [vmem:[%s1217_s2] ss:$0 sm:$0xff] }
  0x4a   : > { %431 = vmatpush.msrb.mxu2 %v406_v36  ;;  %495 = vmatpush.msra.mxu3 %v484_v0  ;;  %v802_v22 = vld [vmem:[%s1219_s4] ss:$0 sm:$0xff] }
  0x4b   : > { %563 = vmatpush.msrb.mxu1 %v554_v62  ;;  %523 = vmatpush.msra.mxu0 %v457_v63 }
  0x4c   : > { %432 = vmatpush.msrb.mxu2 %v405_v39  ;;  %496 = vmatpush.msra.mxu3 %v483_v3 }
  0x4d   : > { %564 = vmatpush.msrb.mxu1 %v553_v1  ;;  %524 = vmatpush.msra.mxu0 %v456_v2 }
  0x4e   : > { %433 = vmatpush.msrb.mxu2 %v404_v41  ;;  %497 = vmatpush.msra.mxu3 %v482_v7 }
  0x4f   : > { %719 = vmatmul.msk.f32.vlgmr.msrb.gmra.mxu2 %vm337_vm2, %v399_v42  ;;  %565 = vmatpush.msrb.mxu1 %v552_v4 }
  0x50   : > { %525 = vmatpush.msra.mxu0 %v455_v5  ;;  %498 = vmatpush.msra.mxu3 %v481_v10 }
  0x51   : > { %566 = vmatpush.msrb.mxu1 %v551_v8 }
  0x52   : > { %526 = vmatpush.msra.mxu0 %v454_v9  ;;  %499 = vmatpush.msra.mxu3 %v480_v13 }
  0x53   : > { %567 = vmatpush.msrb.mxu1 %v550_v11 }
  0x54   : > { %527 = vmatpush.msra.mxu0 %v453_v12  ;;  %500 = vmatpush.msra.mxu3 %v479_v16 }
  0x55   : > { %568 = vmatpush.msrb.mxu1 %v549_v14 }
  0x56   : > { %528 = vmatpush.msra.mxu0 %v452_v15  ;;  %501 = vmatpush.msra.mxu3 %v478_v18 }
  0x57   : > { %720 = vmatmul.msk.f32.gmra.mxu2 %vm337_vm2, %v402_v46  ;;  %569 = vmatpush.msrb.mxu1 %v548_v17 }
  0x58   : > { %502 = vmatpush.msra.mxu3 %v477_v20 }
  0x59   : > { %570 = vmatpush.msrb.mxu1 %v547_v19 }
  0x5a   : > { %503 = vmatpush.msra.mxu3 %v476_v23 }
  0x5b   : > { %571 = vmatpush.msrb.mxu1 %v546_v21 }
  0x5c   : > { %504 = vmatpush.msra.mxu3 %v475_v25 }
  0x5d   : > { %572 = vmatpush.msrb.mxu1 %v545_v24 }
  0x5e   : > { %505 = vmatpush.msra.mxu3 %v474_v27 }
  0x5f   : > { %573 = vmatpush.msrb.mxu1 %v544_v26 }
  0x61   : > { %574 = vmatpush.msrb.mxu1 %v543_v28 }
  0xbd   : > { %v390_v31 = vpop.f32.mrf.mxu1 }
  0xc2   : > { %v361_v29 = vpop.f32.mrf.mxu2 }
  0xc3   : > { %v391_v32 = vadd.f32 %v390_v31, %v361_v29 }
  0xc5   : > { %v393_v37 = vpop.f32.mrf.mxu1 }
  0xca   : > { %v364_v30 = vpop.f32.mrf.mxu2 }
  0xcb   : > { %v394_v39 = vadd.f32 %v393_v37, %v364_v30 }
  0xd2   : > { %v435_v34 = vpop.f32.mrf.mxu2 }
  0xd3   : > { %v441_v35 = vadd.f32 %v435_v34, %v391_v32 }
  0xd5   : > { %v447_v36 = vadd.f32 %v801_v33, %v441_v35 }
  0xd7   : > { %v449_v38 = vmax.f32 %v447_v36, 0.0 }
  0xd9   : > { %529 = vmatmul.f32.vlgmr.msra.gmra.mxu0 %v449_v38  ;;  %v468_v45 = vrot.slane %v449_v38, 7  ;;  %v536_v47 = vrot.slane %v449_v38, 1 }
  0xda   : > { %v438_v40 = vpop.f32.mrf.mxu2 }
  0xdb   : > { %v442_v41 = vadd.f32 %v438_v40, %v394_v39 }
  0xdd   : > { %v448_v42 = vadd.f32 %v801_v33, %v442_v41 }
  0xdf   : > { %v450_v43 = vmax.f32 %v448_v42, 0.0 }
  0xe1   : > { %532 = vmatmul.f32.gmra.mxu0 %v450_v43  ;;  %v469_v46 = vrot.slane %v450_v43, 7  ;;  %v537_v48 = vrot.slane %v450_v43, 1 }
  0xe3   : > { %v471_v49 = vsel %vm324_vm0, %v469_v46, %v468_v45  ;;  %v538_v50 = vsel %vm398_vm3, %v536_v47, %v537_v48  ;;  %v470_v51 = vsel %vm324_vm0, %v468_v45, %v469_v46  ;;  %v539_v52 = vsel %vm398_vm3, %v537_v48, %v536_v47 }
  0xe4   : > { %721 = vmatmul.msk.f32.vlgmr.msra.gmra.mxu3 %vm1130_vm1, %v471_v49  ;;  %575 = vmatmul.f32.vlgmr.msrb.gmra.mxu1 %v538_v50 }
  0xec   : > { %509 = vmatmul.f32.gmra.mxu3 %v470_v51  ;;  %722 = vmatmul.msk.f32.gmra.mxu1 %vm1153_vm4, %v539_v52 }
 0x156   : > { %v530_v53 = vpop.f32.mrf.mxu0 }
 0x15e   : > { %v533_v6 = vpop.f32.mrf.mxu0 }
 0x161   : > { %v576_v54 = vpop.f32.mrf.mxu1 }
 0x167   : > { %v507_v55 = vpop.f32.mrf.mxu3 }
 0x168   : > { %v531_v56 = vadd.f32 %v530_v53, %v507_v55 }
 0x169   : > { %v579_v61 = vpop.f32.mrf.mxu1 }
 0x16a   : > { %v582_v57 = vadd.f32 %v576_v54, %v531_v56 }
 0x16c   : > { %v588_v58 = vadd.f32 %v802_v22, %v582_v57 }
 0x16e   : > { %v590_v59 = vmax.f32 %v588_v58, 0.0 }
 0x16f   : > { %v510_v60 = vpop.f32.mrf.mxu3 }
 0x170   : > { %592 = vst [vmem:[%s277_s30] sm:$0xff] %v590_v59  ;;  %v534_v44 = vadd.f32 %v533_v6, %v510_v60 }
 0x172   : > { %v583_v62 = vadd.f32 %v579_v61, %v534_v44 }
 0x174   : > { %v589_v63 = vadd.f32 %v802_v22, %v583_v62 }
 0x176   : > { %v591_v0 = vmax.f32 %v589_v63, 0.0 }
 0x178   : > { %593 = vst [vmem:[%s277_s30 + $0x8] sm:$0xff] %v591_v0 }
 0x179   : > { %920 = shalt.err (!%p917_p10)
}
 0x17a   : > { %s969_s8 = smov 128   ;;  %s970_s9 = smov 8  }
 0x17b   : > { %740 = dma.vmem_to_hbm [thread:$0]  (%p1073_p3), %s608_s6, 256, %s610_s7, %s595_s22, %s969_s8, %s969_s8, %s970_s9  }
 0x17c PF: > { %s624_s12 = sand.u32 1, %s951_s18   ;;  %p1232_p12 = scmp.ge.s32.totalorder %s963_s21, 2 }
 0x17d   : > { %s625_s13 = scalar_lea.sflag [#allocation4], %s624_s12 }
 0x17e   : > { %p754_p13 = pnand %p1232_p12, %p1036_p6 }
 0x180   : > { %p755_p0 = pneg %p754_p13 }
 0x182   : > { %946 = dma.done.wait (%p755_p0), %s625_s13, 256  }
 0x183   : > { %948 = vsyncadd (%p755_p0), %s625_s13, 4294967040  ;;  %p19_p5 = scmp.ge.s32.totalorder %s1063_s14, 4   ;;  %s1233_s18 = smov %s955_s19 }
 0x184   : > { %s1234_s19 = smov %s959_s20  ;;  %s1235_s20 = smov %s1079_s23 }
 0x185   : > { %s1236_s21 = smov %s1063_s14  ;;  %21 = sbr.rel (!%p19_p5) target bundleno = 6 (0x6), region = 97 }
 0x18a   :  { %631 = vsyncpa [#allocation3], 1 }
 0x18b   :  { %633 = vsyncpa [#allocation3 + $0x1], 1 }
 0x18c   :  { %634 = vsyncpa [#allocation6], 1 }
 0x18d   :  { %635 = vsyncpa [#allocation4], 1 }
 0x18e   :  { %637 = vsyncpa [#allocation4 + $0x1], 1 }

</bundles_post_ra>
